<compile_context>
chip_gen: v6e
topology: v6e:2x2x1
jax: 0.10.0
libtpu: 0.0.40
codegen_flags: <defaults>
</compile_context>

<pallas_src>
import math
import functools

import jax
import jax.numpy as jnp
from jax.experimental import pallas as pl
from jax.experimental.pallas import tpu as pltpu

_MIB = 1024 * 1024
_MASK = -1e30  # finite "-inf" used when masking ragged vocab tiles


def _round_up(x, m):
    return ((x + m - 1) // m) * m


def _round_down(x, m):
    return (x // m) * m


def _vmem_budget_bytes():
    """Usable per-core VMEM budget (physical capacity minus headroom)."""
    try:
        cap = int(pltpu.get_tpu_info().vmem_capacity_bytes)
    except Exception:
        cap = 64 * _MIB          # conservative default (v7x = 64 MiB / TC)
    return (cap * 3) // 4


# ------------------------------ kernels ------------------------------------

def _fused_kernel(x_ref, w_ref, b_ref, o_ref):
    """log_softmax(x @ W + b) for one row tile; whole vocab resident in VMEM."""
    logits = jnp.dot(x_ref[...], w_ref[...], preferred_element_type=jnp.float32)
    logits = logits + b_ref[...].astype(jnp.float32)
    m = jnp.max(logits, axis=-1, keepdims=True)
    shifted = logits - m
    lse = jnp.log(jnp.sum(jnp.exp(shifted), axis=-1, keepdims=True))
    o_ref[...] = (shifted - lse).astype(o_ref.dtype)


def _lse_kernel(x_ref, w_ref, b_ref, lse_ref, m_sc, l_sc, *,
                vocab_size, block_v, need_mask):
    """Pass 1 of the vocab-streamed path: online logsumexp over vocab tiles."""
    j = pl.program_id(1)

    @pl.when(j == 0)
    def _():
        m_sc[...] = jnp.full_like(m_sc, _MASK)
        l_sc[...] = jnp.zeros_like(l_sc)

    logits = jnp.dot(x_ref[...], w_ref[...], preferred_element_type=jnp.float32)
    logits = logits + b_ref[...].astype(jnp.float32)
    if need_mask:  # ragged last vocab tile: drop out-of-range columns
        col = j * block_v + jax.lax.broadcasted_iota(jnp.int32, logits.shape, 1)
        logits = jnp.where(col < vocab_size, logits, _MASK)

    m_prev = m_sc[...]
    m_new = jnp.maximum(m_prev, jnp.max(logits, axis=-1, keepdims=True))
    l_sc[...] = l_sc[...] * jnp.exp(m_prev - m_new) + jnp.sum(
        jnp.exp(logits - m_new), axis=-1, keepdims=True)
    m_sc[...] = m_new

    @pl.when(j == pl.num_programs(1) - 1)
    def _():
        lse_ref[...] = m_sc[...] + jnp.log(l_sc[...])


def _normalize_kernel(x_ref, w_ref, b_ref, lse_ref, o_ref):
    """Pass 2 of the vocab-streamed path: recompute logits, subtract lse."""
    logits = jnp.dot(x_ref[...], w_ref[...], preferred_element_type=jnp.float32)
    logits = logits + b_ref[...].astype(jnp.float32)
    o_ref[...] = (logits - lse_ref[...]).astype(o_ref.dtype)


# ------------------------------ wrapper -------------------------------------

def generator_forward(x, w, b, *, out_dtype=None, row_tile=256, vocab_tile=None,
                      force_streaming=False, compute_dtype=jnp.bfloat16):
    """log_softmax(x @ w + b, axis=-1), fused in Pallas.

    x: (..., D)  w: (D, V)  b: (V,) or (1, V)  ->  (..., V) in `out_dtype`
    (default: x.dtype). Matmul runs in `compute_dtype` (bf16) with f32
    accumulation; softmax statistics are f32.
    """
    *lead, D = x.shape
    assert w.shape[0] == D, (w.shape, D)
    V = w.shape[1]

    out_dtype = jnp.dtype(out_dtype) if out_dtype is not None else x.dtype
    compute_dtype = jnp.dtype(compute_dtype)

    x2 = x.reshape(-1, D)
    M = x2.shape[0]
    b2 = b.reshape(1, V).astype(jnp.float32)   # bias added after f32 accumulation

    # bf16 operands feed the MXU at full rate and halve resident-weight VMEM.
    if x2.dtype != compute_dtype:
        x2 = x2.astype(compute_dtype)
    if w.dtype != compute_dtype:
        w = w.astype(compute_dtype)

    budget = _vmem_budget_bytes()
    cbytes = compute_dtype.itemsize
    obytes = out_dtype.itemsize

    def pick_tm(mem_cap_rows):
        tm = min(row_tile, int(mem_cap_rows))
        if M > 8:   # keep >= 2 grid steps so both v7x TensorCores get work
            tm = min(tm, max(8, _round_down(pl.cdiv(M, 2), 8)))
        tm = min(tm, _round_up(M, 8))
        tm = max(8, _round_down(tm, 8))
        if tm >= 128:                     # MXU-friendly when rows are plentiful
            tm = _round_down(tm, 128)
        return tm

    # Per-row VMEM: double-buffered x/out blocks + two f32 (.,V) temporaries.
    per_row = 2 * D * cbytes + 2 * V * obytes + 2 * V * 4 + 64
    # Resident W/b are fetched once but allocated double-buffered by default.
    resident_bytes = 2 * D * V * cbytes + 2 * V * 4
    fits_resident = resident_bytes + 8 * per_row + 2 * _MIB <= budget

    if fits_resident and not force_streaming:
        # --------------- resident-weight fused path ----------------
        tm = pick_tm((budget - resident_bytes - 2 * _MIB) // per_row)
        out = pl.pallas_call(
            _fused_kernel,
            grid=(pl.cdiv(M, tm),),
            in_specs=[
                pl.BlockSpec((tm, D), lambda i: (i, 0)),   # activations, row-tiled
                pl.BlockSpec((D, V), lambda i: (0, 0)),    # weight, VMEM-resident
                pl.BlockSpec((1, V), lambda i: (0, 0)),    # bias,   VMEM-resident
            ],
            out_specs=pl.BlockSpec((tm, V), lambda i: (i, 0)),  # lane-dense vocab-last
            out_shape=jax.ShapeDtypeStruct((M, V), out_dtype),
            compiler_params=pltpu.CompilerParams(
                dimension_semantics=("parallel",),
                vmem_limit_bytes=int(budget)),
            cost_estimate=pl.CostEstimate(
                flops=2 * M * D * V,
                transcendentals=M * V,
                bytes_accessed=M * D * cbytes + D * V * cbytes + V * 4
                               + M * V * obytes),
        )(x2, w, b2)
        return out.reshape(*lead, V)

    # --------------- vocab-streamed path (large V) ----------------
    tm = pick_tm(row_tile)
    if vocab_tile is None:
        per_col = 2 * D * cbytes + 2 * 4 + 2 * tm * obytes + 2 * tm * 4
        avail = budget - 2 * tm * D * cbytes - 4 * _MIB
        tv = max(128, _round_down(max(avail, 0) // per_col, 128))
        tv = min(tv, _round_up(V, 128), 4096)
    else:
        tv = int(vocab_tile)   # must be a multiple of 128 (or equal to V)

    grid = (pl.cdiv(M, tm), pl.cdiv(V, tv))
    matmul_cost = 2 * M * D * V
    w_stream_bytes = grid[0] * D * V * cbytes   # W re-streamed once per row tile

    lse = pl.pallas_call(
        functools.partial(_lse_kernel, vocab_size=V, block_v=tv,
                          need_mask=(V % tv != 0)),
        grid=grid,
        in_specs=[
            pl.BlockSpec((tm, D), lambda i, j: (i, 0)),
            pl.BlockSpec((D, tv), lambda i, j: (0, j)),
            pl.BlockSpec((1, tv), lambda i, j: (0, j)),
        ],
        out_specs=pl.BlockSpec((tm, 1), lambda i, j: (i, 0)),   # accumulator
        out_shape=jax.ShapeDtypeStruct((M, 1), jnp.float32),
        scratch_shapes=[pltpu.VMEM((tm, 1), jnp.float32),       # running max
                        pltpu.VMEM((tm, 1), jnp.float32)],      # running sum
        compiler_params=pltpu.CompilerParams(
            dimension_semantics=("parallel", "arbitrary"),
            vmem_limit_bytes=int(budget)),
        cost_estimate=pl.CostEstimate(
            flops=matmul_cost, transcendentals=M * V,
            bytes_accessed=M * D * cbytes + w_stream_bytes + M * 4),
    )(x2, w, b2)

    out = pl.pallas_call(
        _normalize_kernel,
        grid=grid,
        in_specs=[
            pl.BlockSpec((tm, D), lambda i, j: (i, 0)),
            pl.BlockSpec((D, tv), lambda i, j: (0, j)),
            pl.BlockSpec((1, tv), lambda i, j: (0, j)),
            pl.BlockSpec((tm, 1), lambda i, j: (i, 0)),
        ],
        out_specs=pl.BlockSpec((tm, tv), lambda i, j: (i, j)),
        out_shape=jax.ShapeDtypeStruct((M, V), out_dtype),
        compiler_params=pltpu.CompilerParams(
            dimension_semantics=("parallel", "parallel"),
            vmem_limit_bytes=int(budget)),
        cost_estimate=pl.CostEstimate(
            flops=matmul_cost, transcendentals=0,
            bytes_accessed=M * D * cbytes + w_stream_bytes + M * 4
                           + M * V * obytes),
    )(x2, w, b2, lse)
    return out.reshape(*lead, V)


# ------------------------------ parameters ----------------------------------

def init_generator_params(key, model_depth, vocab_size, *, param_dtype=jnp.bfloat16):
    """torch nn.Linear default init: U(-1/sqrt(fan_in), 1/sqrt(fan_in)).

    W is stored in bf16 (MXU operand dtype); bias stays f32 (added after the
    f32 accumulation; negligible size)."""
    k1, k2 = jax.random.split(key)
    bound = 1.0 / math.sqrt(model_depth)
    w = jax.random.uniform(k1, (model_depth, vocab_size), jnp.float32, -bound, bound)
    b = jax.random.uniform(k2, (vocab_size,), jnp.float32, -bound, bound)
    return w.astype(param_dtype), b


# --------------------------------- main --------------------------------------

if __name__ == "__main__":
    MODEL_DEPTH, VOCAB_SIZE = 32, 128      # vocab on last axis -> lane-dense stores
    B, S = 2, 8

    key = jax.random.PRNGKey(0)
    kx, kp = jax.random.split(key)

    x = jax.random.normal(kx, (B, S, MODEL_DEPTH), jnp.float32)
    w, b = init_generator_params(kp, MODEL_DEPTH, VOCAB_SIZE)   # bf16 W, f32 b

    def reference(x, w, b):
        logits = jnp.einsum("bsd,dv->bsv", x.astype(jnp.bfloat16),
                            w.astype(jnp.bfloat16),
                            preferred_element_type=jnp.float32)
        return jax.nn.log_softmax(logits + b.astype(jnp.float32), axis=-1)

    ref = reference(x, w, b)

    # 1) fused resident-weight path, f32 log-probs
    fwd = jax.jit(functools.partial(generator_forward, out_dtype=jnp.float32))
    out = jax.block_until_ready(fwd(x, w, b))
    assert out.shape == (B, S, VOCAB_SIZE)
    assert jnp.allclose(out, ref, atol=2e-3, rtol=2e-3), \
        f"resident path mismatch: max|diff|={jnp.max(jnp.abs(out - ref))}"

    # 2) bf16 log-probs (halves HBM writeback for large vocabs)
    fwd_bf16 = jax.jit(functools.partial(generator_forward, out_dtype=jnp.bfloat16))
    out_bf16 = jax.block_until_ready(fwd_bf16(x, w, b))
    assert out_bf16.dtype == jnp.bfloat16
    assert jnp.allclose(out_bf16.astype(jnp.float32), ref, atol=6e-2, rtol=6e-2)

    # 3) vocab-streamed online-logsumexp path, forced at a small ragged vocab
    V2 = 192                                 # 2 vocab tiles of 128, last one ragged
    w2, b2 = init_generator_params(kp, MODEL_DEPTH, V2)
    ref2 = reference(x, w2, b2)
    fwd_stream = jax.jit(functools.partial(
        generator_forward, out_dtype=jnp.float32,
        force_streaming=True, vocab_tile=128))
    out2 = jax.block_until_ready(fwd_stream(x, w2, b2))
    assert out2.shape == (B, S, V2)
    assert jnp.allclose(out2, ref2, atol=2e-3, rtol=2e-3), \
        f"streamed path mismatch: max|diff|={jnp.max(jnp.abs(out2 - ref2))}"

    print("KERNEL_OK")
</pallas_src>

<mosaic_0001>
module attributes {stable_mosaic.version = 11 : i64} {
  func.func @_fused_kernel(%arg0: i32, %arg1: memref<8x32xbf16, #tpu.memory_space<vmem>>, %arg2: memref<32x128xbf16, #tpu.memory_space<vmem>>, %arg3: memref<1x128xf32, #tpu.memory_space<vmem>>, %arg4: memref<8x128xf32, #tpu.memory_space<vmem>>) attributes {dimension_semantics = [#tpu.dimension_semantics<parallel>], iteration_bounds = array<i64: 2>, scalar_prefetch = 0 : i64, scratch_operands = 0 : i64, tpu.core_type = #tpu.core_type<tc>, window_params = [{transform_indices = @transform_0, window_bounds = array<i64: 8, 32>}, {pipeline_mode = #tpu.pipeline_mode<synchronous>, transform_indices = @transform_1, window_bounds = array<i64: 32, 128>}, {pipeline_mode = #tpu.pipeline_mode<synchronous>, transform_indices = @transform_2, window_bounds = array<i64: 1, 128>}, {transform_indices = @transform_3, window_bounds = array<i64: 8, 128>}]} {
    %c0 = arith.constant 0 : index
    %c0_0 = arith.constant 0 : index
    %0 = vector.load %arg1[%c0, %c0_0] : memref<8x32xbf16, #tpu.memory_space<vmem>>, vector<8x32xbf16>
    %c0_1 = arith.constant 0 : index
    %c0_2 = arith.constant 0 : index
    %1 = vector.load %arg2[%c0_1, %c0_2] : memref<32x128xbf16, #tpu.memory_space<vmem>>, vector<32x128xbf16>
    %cst = arith.constant dense<0.000000e+00> : vector<8x128xf32>
    %2 = tpu.matmul %0, %1, %cst {dimension_numbers = #tpu.dot_dimension_numbers<[1], [0], [0], [1], [0, 0, 1, 1], [], []>} : vector<8x32xbf16>, vector<32x128xbf16>, vector<8x128xf32> -> vector<8x128xf32>
    %c0_3 = arith.constant 0 : index
    %c0_4 = arith.constant 0 : index
    %3 = vector.load %arg3[%c0_3, %c0_4] : memref<1x128xf32, #tpu.memory_space<vmem>>, vector<1x128xf32>
    %4 = vector.broadcast %3 : vector<1x128xf32> to vector<8x128xf32>
    %5 = arith.addf %2, %4 : vector<8x128xf32>
    %cst_5 = arith.constant dense<0xFF800000> : vector<8xf32>
    %6 = vector.multi_reduction <maximumf>, %5, %cst_5 [1] : vector<8x128xf32> to vector<8xf32>
    %7 = vector.shape_cast %6 : vector<8xf32> to vector<8x1xf32>
    %8 = vector.broadcast %7 : vector<8x1xf32> to vector<8x128xf32>
    %9 = arith.subf %5, %8 : vector<8x128xf32>
    %10 = math.exp %9 : vector<8x128xf32>
    %cst_6 = arith.constant dense<0.000000e+00> : vector<8xf32>
    %11 = vector.multi_reduction <add>, %10, %cst_6 [1] : vector<8x128xf32> to vector<8xf32>
    %12 = vector.shape_cast %11 : vector<8xf32> to vector<8x1xf32>
    %13 = math.log %12 : vector<8x1xf32>
    %14 = vector.broadcast %13 : vector<8x1xf32> to vector<8x128xf32>
    %15 = arith.subf %9, %14 : vector<8x128xf32>
    %c0_7 = arith.constant 0 : index
    %c0_8 = arith.constant 0 : index
    %16 = vector.load %arg4[%c0_7, %c0_8] : memref<8x128xf32, #tpu.memory_space<vmem>>, vector<8x128xf32>
    tpu.vector_store %arg4[%c0_7, %c0_8], %15 {strides = array<i32>} : memref<8x128xf32, #tpu.memory_space<vmem>>, vector<8x128xf32>,
    return
  }
  func.func @transform_0(%arg0: i32) -> (i32, i32) {
    %c0_i32 = arith.constant 0 : i32
    %c0_i32_0 = arith.constant 0 : i32
    return %arg0, %c0_i32 : i32, i32
  }
  func.func @transform_1(%arg0: i32) -> (i32, i32) {
    %c0_i32 = arith.constant 0 : i32
    %c0_i32_0 = arith.constant 0 : i32
    %c0_i32_1 = arith.constant 0 : i32
    return %c0_i32, %c0_i32_0 : i32, i32
  }
  func.func @transform_2(%arg0: i32) -> (i32, i32) {
    %c0_i32 = arith.constant 0 : i32
    %c0_i32_0 = arith.constant 0 : i32
    %c0_i32_1 = arith.constant 0 : i32
    return %c0_i32, %c0_i32_0 : i32, i32
  }
  func.func @transform_3(%arg0: i32) -> (i32, i32) {
    %c0_i32 = arith.constant 0 : i32
    %c0_i32_0 = arith.constant 0 : i32
    return %arg0, %c0_i32 : i32, i32
  }
}

</mosaic_0001>

<bundles_post_ra>
// kernel: generator_forward.1
= control target key start
LH: loop header
LB: loop body
LE: loop exit
PB: predicated region body
PF: predicated region fallthrough
CT: control target
= control target key end

     0   :  { %8 = vsyncpa [#allocation3], 0  ;;  %s572_s0 = inlined_call_operand.vmem [shape: bf16[16,32], index: 0, kind: input, shape index: {}]   ;;  %s573_s1 = inlined_call_operand.vmem [shape: bf16[32,128], index: 1, kind: input, shape index: {}]   ;;  %s574_s2 = inlined_call_operand.vmem [shape: f32[1,128], index: 2, kind: input, shape index: {}]   ;;  %s575_s3 = inlined_call_operand.hbm [shape: f32[16,128], index: 3, kind: output, shape index: {}]  }
   0x1   :  { %10 = vsyncpa [#allocation3 + $0x1], 0  ;;  %s476_s12 = smov 0   ;;  %s478_s13 = smov 0  }
   0x2   :  { %s480_s14 = smov 0   ;;  %s482_s15 = smov 0  }
   0x3 LB: > { %s497_s16 = sadd.s32 4294967295, %s451_s15   ;;  %s319_s17 = sadd.s32 4294967294, %s451_s15   ;;  %s451_s15 = sphi %s482_s15, %s581_s15   ;;  %s447_s14 = sphi %s480_s14, %s580_s14   ;;  %s443_s13 = sphi %s478_s13, %s579_s13   ;;  %s439_s12 = sphi %s476_s12, %s578_s12  }
   0x4   : > { %s501_s18 = sadd.s32 1, %s451_s15   ;;  %s91_s19 = sadd.s32 1, %s447_s14 }
   0x5   : > { %s88_s20 = ssub.s32 %s451_s15, %s501_s18  ;;  %p101_p0 = scmp.ne.s32.totalorder %s447_s14, %s443_s13 }
   0x6   : > { %p89_p1 = scmp.eq.s32.totalorder %s88_s20, 0  ;;  %p102_p2 = scmp.eq.s32.totalorder %s497_s16, 1 }
   0x7   : > { %p107_p3 = scmp.ne.s32.totalorder %s443_s13, %s439_s12  ;;  %p108_p4 = scmp.eq.s32.totalorder %s319_s17, 1 }
   0x8   : > { %s512_s21 = scalar_select %p89_p1, %s447_s14, %s91_s19  }
   0x9   : > { %p514_p5 = por %p102_p2, %p101_p0  ;;  %p518_p6 = por %p108_p4, %p107_p3 }
   0xa   : > { %p322_p7 = scmp.ge.s32.totalorder %s451_s15, 1  ;;  %p139_p8 = scmp.lt.s32.totalorder %s451_s15, 3 }
   0xc   : > { %p140_p9 = pnand %p322_p7, %p139_p8 }
   0xd   : > { %p162_p10 = scmp.lt.s32.totalorder (!%p140_p9), %s497_s16, 1  ;;  %s159_s8 = sand.u32 (!%p140_p9), 1, %s443_s13  }
   0xe   : > { %143 = sbr.rel (%p140_p9) target bundleno = 548 (0x224), region = 32  ;;  %s323_s9 = sshll.u32 (!%p140_p9), %s159_s8, 3 }
   0xf   : > { %s330_s10 = sshll.u32 (!%p140_p9), %s497_s16, 7  ;;  %s161_s11 = scalar_lea.vmem (!%p140_p9), [#allocation2], %s323_s9 }
  0x10   : > { %s260_s17 = sshll.u32 (!%p140_p9), %s161_s11, 4  ;;  %s258_s24 = scalar_lea.hbm (!%p140_p9), %s575_s3, %s330_s10  ;;  %s261_s17 = int_to_ptr.vmem [resolvable:$true] %s260_s17 }
  0x11   : > { %s247_s25 = scalar_lea.sflag (!%p140_p9), [#allocation3], %s159_s8  ;;  %s391_s26 = scalar_lea.vmem (!%p140_p9), %s261_s17, 128 }
  0x12   : > { %p392_p11 = scmp.ne.s32.totalorder (!%p140_p9), %s261_s17, %s391_s26  ;;  %s455_s27 = smov (!%p140_p9), [#allocation2]  }
  0x13   : > { %v385_v0 = vld [vmem:[%s573_s1 + $0x8] sm:$0xff]   ;;  %v453_v1 = vmov 0.0   ;;  %v386_v2 = vld [vmem:[%s573_s1] sm:$0xff]   ;;  %vm454_vm0 = vmmov 0   ;;  %s163_s28 = scalar_select %p162_p10, %s497_s16, 1  ;;  %vm191_vm1 = vcmask 261120  }
  0x14   : > { %336 = vmatprep.subr.bf16.mxu0 %v453_v1  ;;  %340 = vmatprep.mubr.msk.bf16.mxu0 %vm454_vm0, %v453_v1  ;;  %v325_v4 = vld [vmem:[%s574_s2] ss:$0 sm:$0xff]  ;;  %p393_p12 = pnand %p392_p11, %p514_p5 }
  0x15   : > { %337 = vmatpush3.bf16.msra.mxu0 %v385_v0  ;;  %s324_s29 = sshll.u32 %s163_s28, 2  ;;  %s395_s28 = sshll.u32 %s455_s27, 4  ;;  %s396_s28 = int_to_ptr.vmem [resolvable:$false] %s395_s28 }
  0x16   : > { %338 = vmatprep.subr.bf16.mxu0 %v453_v1  ;;  %s165_s5 = scalar_lea.vmem %s572_s0, %s324_s29  ;;  %p394_p13 = pneg %p393_p12 }
  0x17   : > { %v167_v3 = vld [vmem:[%s165_s5] sm:$0xf]  ;;  %s397_s16 = scalar_lea.vmem %s396_s28, 256  ;;  %p398_p0 = scmp.lt.s32.totalorder %s261_s17, %s396_s28 }
  0x18   : > { %p399_p1 = scmp.lt.s32.totalorder %s397_s16, %s391_s26 }
  0x19   : > { %339 = vmatpush3.bf16.msra.mxu0 %v386_v2 }
  0x1a   : > { %p400_p2 = por %p399_p1, %p398_p0 }
  0x1c   : > { %341 = vmatmul.mubr.msk.bf16.vlgmr.msra.gmra.mxu0 %vm191_vm1, %v167_v3  ;;  %p401_p3 = pnand %p400_p2, %p394_p13 }
  0xdc   : > { %v229_v5 = vpop.f32.mrf.mxu0 }
  0xdd   : > { %v230_v6 = vadd.f32 %v325_v4, %v229_v5 }
  0xde   : > { %v342_v7 = vpop.f32.mrf.mxu0 }
  0xdf   : > { %235 = vmax.xlane.f32.xlu0 %v230_v6 }
  0xe0   : > { %v232_v8 = vpop.f32.mrf.mxu0 }
  0xe2   : > { %v343_v9 = vpop.f32.mrf.mxu0 }
 0x168   : > { %v236_v10 = vpop.xlane.xlu0 %235 }
 0x169   : > { %v237_v11 = vsub.f32 %v230_v6, %v236_v10 }
 0x16b   : > { %v238_v12 = vmul.f32 1.442695, %v237_v11 }
 0x16d   : > { %387 = vpow2.f32 %v238_v12 }
 0x17a   : > { %v388_v13 = vpop.eup %387 }
 0x17b   : > { %240 = vadd.xlane.f32.xlu0 %v388_v13 }
 0x204   : > { %v241_v14 = vpop.xlane.xlu0 %240 }
 0x205   : > { %389 = vlog2.f32 %v241_v14 }
 0x212   : > { %v390_v15 = vpop.eup %389 }
 0x213   : > { %v243_v16 = vmul.f32 0.6931472, %v390_v15 }
 0x215   : > { %v244_v17 = vsub.f32 %v237_v11, %v243_v16 }
 0x217   : > { %245 = vst [vmem:[%s161_s11] sm:$0xff] %v244_v17 }
 0x218   : > { %404 = shalt.err (!%p401_p3)
}
 0x219   : > { %s405_s29 = scalar_lea.hbm %s258_s24, 128  ;;  %s409_s5 = scalar_lea.hbm %s575_s3, 256 }
 0x21a   : > { %p406_p4 = scmp.ne.s32.totalorder %s258_s24, %s405_s29  ;;  %p410_p9 = scmp.lt.s32.totalorder %s258_s24, %s575_s3 }
 0x21b   : > { %p411_p10 = scmp.lt.s32.totalorder %s409_s5, %s405_s29 }
 0x21c   : > { %p407_p7 = pnand %p406_p4, %p514_p5 }
 0x21d   : > { %p412_p11 = por %p411_p10, %p410_p9 }
 0x21e   : > { %p408_p8 = pneg %p407_p7 }
 0x220   : > { %p413_p12 = pnand %p412_p11, %p408_p8 }
 0x222   : > { %416 = shalt.err (!%p413_p12)
}
 0x223   : > { %344 = dma.vmem_to_hbm [thread:$0]  (%p514_p5), %s261_s17, 128, %s258_s24, %s247_s25  }
 0x224 PF: > { %p350_p13 = scmp.ge.s32.totalorder %s451_s15, 2  ;;  %s272_s8 = sand.u32 1, %s439_s12  }
 0x225   : > { %s273_s9 = scalar_lea.sflag [#allocation3], %s272_s8 }
 0x226   : > { %p347_p0 = pnand %p350_p13, %p518_p6 }
 0x228   : > { %p348_p1 = pneg %p347_p0 }
 0x22a   : > { %434 = dma.done.wait (%p348_p1), %s273_s9, 128  }
 0x22b   : > { %436 = vsyncadd (%p348_p1), %s273_s9, 4294967168  ;;  %p13_p2 = scmp.ge.s32.totalorder %s501_s18, 4   ;;  %s578_s12 = smov %s443_s13 }
 0x22c   : > { %s579_s13 = smov %s447_s14  ;;  %s580_s14 = smov %s512_s21 }
 0x22d   : > { %s581_s15 = smov %s501_s18  ;;  %15 = sbr.rel (!%p13_p2) target bundleno = 3 (0x3), region = 67 }
 0x232   :  { %278 = vsyncpa [#allocation3], 1 }
 0x233   :  { %280 = vsyncpa [#allocation3 + $0x1], 1 }

</bundles_post_ra>
